<compile_context>
chip_gen: v5e
topology: v5e:2x2
jax: 0.10.0
libtpu: 0.0.40
codegen_flags: <defaults>
</compile_context>

<pallas_src>
import functools
import math

import jax
import jax.numpy as jnp
from jax.experimental import pallas as pl
from jax.experimental.pallas import tpu as pltpu


def _cdiv(a: int, b: int) -> int:
    return -(-a // b)


def _round_up(a: int, m: int) -> int:
    return _cdiv(a, m) * m


def _choose_group(window: int, embed: int, itemsize: int,
                  max_weight_bytes: int = 8 << 20) -> int:
    """Smallest G making (G*W) a multiple of 128, unless the block-diagonal
    weight (G*W, G*E) would get unreasonably large (then fall back to G=1)."""
    if window % 128 == 0:
        return 1
    g = 128 // math.gcd(window, 128)
    if g * g * window * embed * itemsize > max_weight_bytes:
        return 1
    return g


def _choose_row_tile(mg: int, row_bytes: int, *,
                     target_bytes: int = 4 << 20, sublane: int = 8) -> int:
    """Row tile: ~target_bytes of (x + out) per grid step, a multiple of 8,
    and >= 2 grid steps when there is enough work (v7x megacore sharding)."""
    if mg <= sublane:
        return mg                                   # full-extent block, 1 step
    tm_cap = max(sublane, (target_bytes // row_bytes) // sublane * sublane)
    n_steps = max(1, _cdiv(mg, tm_cap))
    if n_steps == 1 and mg > 2 * sublane:
        n_steps = 2                                 # give both TCs work
    return _round_up(_cdiv(mg, n_steps), sublane)


def _signal_embed_kernel(w_ref, b_ref, x_ref, o_ref):
    # w_ref: (G*W, G*E) grid-resident; b_ref: (1, G*E) grid-resident;
    # x_ref: (TM, G*W); o_ref: (TM, G*E).  Lane axes are multiples of 128.
    acc = jnp.dot(x_ref[...], w_ref[...], preferred_element_type=jnp.float32)
    o_ref[...] = (acc + b_ref[...].astype(jnp.float32)).astype(o_ref.dtype)


@functools.partial(jax.jit, static_argnames=("window_size", "io_dtype"))
def signal_embedding(x, weight, bias, *, window_size, io_dtype=None):
    """Pallas implementation of SignalEmbedding.forward.

    Args:
      x: (B, L, 1) batched or (L, 1) unbatched input.
      weight: (E, 1, W) Conv1d weight.
      bias: (E,) Conv1d bias.
      window_size: W (kernel_size == stride).
      io_dtype: optional dtype (e.g. jnp.bfloat16) for the GEMM inputs/output;
        accumulation stays f32.  None keeps the input dtype.
    Returns:
      (B, S, E) if batched else (S, E), with S = L // W.
    """
    is_batched = x.ndim == 3
    if not is_batched:
        x = x[None]                                  # (1, L, 1)

    B, L, c_in = x.shape
    if c_in != 1:
        raise ValueError("SignalEmbedding expects a single input channel")
    W = int(window_size)
    if L < W:
        raise ValueError(f"sequence length {L} is shorter than window_size {W}")
    E = weight.shape[0]
    S = L // W                                       # conv output length
    M = B * S

    io_dt = jnp.dtype(io_dtype) if io_dtype is not None else jnp.dtype(x.dtype)
    itemsize = io_dt.itemsize

    # ---------------- plain-JAX glue: repack into a lane-dense GEMM ----------
    G = _choose_group(W, E, itemsize)
    KG, NG = G * W, G * E

    x_flat = x[:, : S * W, 0].reshape(M, W).astype(io_dt)          # (M, W)
    w_t = jnp.transpose(weight[:, 0, :], (1, 0)).astype(io_dt)     # (W, E)
    b_row = bias.reshape(1, E).astype(io_dt)                       # (1, E)

    if G > 1:
        eye = jnp.eye(G, dtype=io_dt)
        # bd[g*W + w, h*E + e] = (g == h) * w_t[w, e]
        w_gemm = jnp.einsum("gh,we->gwhe", eye, w_t).reshape(KG, NG)
        b_gemm = jnp.tile(b_row, (1, G))                           # (1, G*E)
    else:
        w_gemm, b_gemm = w_t, b_row

    MG = _cdiv(M, G)
    row_bytes = (KG + NG) * itemsize
    TM = _choose_row_tile(MG, row_bytes)
    MG_pad = _round_up(MG, TM)
    M_pad = MG_pad * G
    if M_pad > M:                                    # pad rows (zeros) to tile
        x_flat = jnp.pad(x_flat, ((0, M_pad - M), (0, 0)))
    x_packed = x_flat.reshape(MG_pad, KG)

    grid = (MG_pad // TM,)
    out_packed = pl.pallas_call(
        _signal_embed_kernel,
        out_shape=jax.ShapeDtypeStruct((MG_pad, NG), io_dt),
        grid_spec=pl.GridSpec(
            grid=grid,
            in_specs=[
                pl.BlockSpec((KG, NG), lambda i: (0, 0)),   # weight: resident
                pl.BlockSpec((1, NG), lambda i: (0, 0)),    # bias: resident
                pl.BlockSpec((TM, KG), lambda i: (i, 0)),   # x row tile
            ],
            out_specs=pl.BlockSpec((TM, NG), lambda i: (i, 0)),
        ),
        compiler_params=pltpu.CompilerParams(
            dimension_semantics=("parallel",),
        ),
    )(w_gemm, b_gemm, x_packed)

    out = out_packed.reshape(M_pad, E)[:M].reshape(B, S, E)
    if not is_batched:
        out = out[0]
    return out


if __name__ == "__main__":
    # Small deterministic setup consistent with the module:
    #   window_size=8, d_model=32.
    window_size = 8
    embed_dim = 32

    key = jax.random.PRNGKey(0)
    k_x, k_w, k_b, k_x2 = jax.random.split(key, 4)

    # Conv1d weight shape: (out_channels, in_channels, kernel_size)
    weight = jax.random.normal(k_w, (embed_dim, 1, window_size), jnp.float32) * 0.1
    bias = jax.random.normal(k_b, (embed_dim,), jnp.float32) * 0.1

    def reference(xx):
        b, l, _ = xx.shape
        s = l // window_size
        xw = xx[:, : s * window_size, 0].reshape(b, s, window_size)
        return jnp.einsum("bsw,ew->bse", xw, weight[:, 0, :]) + bias[None, None, :]

    # 1) Module-scale shape: batch=2, L=64 -> S=8.
    x = jax.random.normal(k_x, (2, 64, 1), jnp.float32)
    out = jax.block_until_ready(
        signal_embedding(x, weight, bias, window_size=window_size))
    ref = reference(x)
    assert out.shape == (2, 8, embed_dim), out.shape
    assert jnp.allclose(out, ref, atol=1e-4, rtol=1e-4)

    # 2) Row count NOT a multiple of the group/tile: batch=3, L=104 -> S=13, M=39.
    x2 = jax.random.normal(k_x2, (3, 104, 1), jnp.float32)
    out2 = jax.block_until_ready(
        signal_embedding(x2, weight, bias, window_size=window_size))
    assert out2.shape == (3, 13, embed_dim), out2.shape
    assert jnp.allclose(out2, reference(x2), atol=1e-4, rtol=1e-4)

    # 3) Larger shape exercising a multi-step grid (megacore path): B=4, L=1024.
    x3 = jax.random.normal(k_x, (4, 1024, 1), jnp.float32)
    out3 = jax.block_until_ready(
        signal_embedding(x3, weight, bias, window_size=window_size))
    assert out3.shape == (4, 128, embed_dim), out3.shape
    assert jnp.allclose(out3, reference(x3), atol=1e-4, rtol=1e-4)

    # 4) Unbatched path: (L, 1) -> (S, E).
    out_u = jax.block_until_ready(
        signal_embedding(x[0], weight, bias, window_size=window_size))
    assert out_u.shape == (8, embed_dim), out_u.shape
    assert jnp.allclose(out_u, ref[0], atol=1e-4, rtol=1e-4)

    # 5) bf16 I/O variant (halves HBM traffic on v6e/v7x); looser tolerance.
    out_bf16 = jax.block_until_ready(
        signal_embedding(x, weight, bias, window_size=window_size,
                         io_dtype=jnp.bfloat16))
    assert out_bf16.dtype == jnp.bfloat16
    assert jnp.allclose(out_bf16.astype(jnp.float32), ref, atol=5e-2, rtol=5e-2)

    print("KERNEL_OK")
</pallas_src>

<mosaic_0001>
module attributes {stable_mosaic.version = 11 : i64} {
  func.func @_signal_embed_kernel(%arg0: i32, %arg1: memref<128x512xf32, #tpu.memory_space<vmem>>, %arg2: memref<1x512xf32, #tpu.memory_space<vmem>>, %arg3: memref<1x128xf32, #tpu.memory_space<vmem>>, %arg4: memref<1x512xf32, #tpu.memory_space<vmem>>) attributes {dimension_semantics = [#tpu.dimension_semantics<parallel>], iteration_bounds = array<i64: 1>, scalar_prefetch = 0 : i64, scratch_operands = 0 : i64, tpu.core_type = #tpu.core_type<tc>, window_params = [{pipeline_mode = #tpu.pipeline_mode<synchronous>, transform_indices = @transform_0, window_bounds = array<i64: 128, 512>}, {pipeline_mode = #tpu.pipeline_mode<synchronous>, transform_indices = @transform_1, window_bounds = array<i64: 1, 512>}, {transform_indices = @transform_2, window_bounds = array<i64: 1, 128>}, {transform_indices = @transform_3, window_bounds = array<i64: 1, 512>}]} {
    %c0 = arith.constant 0 : index
    %c0_0 = arith.constant 0 : index
    %0 = vector.load %arg3[%c0, %c0_0] : memref<1x128xf32, #tpu.memory_space<vmem>>, vector<1x128xf32>
    %c0_1 = arith.constant 0 : index
    %c0_2 = arith.constant 0 : index
    %1 = vector.load %arg1[%c0_1, %c0_2] : memref<128x512xf32, #tpu.memory_space<vmem>>, vector<128x512xf32>
    %cst = arith.constant dense<0.000000e+00> : vector<1x512xf32>
    %2 = tpu.matmul %0, %1, %cst {dimension_numbers = #tpu.dot_dimension_numbers<[1], [0], [0], [1], [0, 0, 1, 1], [], []>} : vector<1x128xf32>, vector<128x512xf32>, vector<1x512xf32> -> vector<1x512xf32>
    %c0_3 = arith.constant 0 : index
    %c0_4 = arith.constant 0 : index
    %3 = vector.load %arg2[%c0_3, %c0_4] : memref<1x512xf32, #tpu.memory_space<vmem>>, vector<1x512xf32>
    %4 = arith.addf %2, %3 : vector<1x512xf32>
    %c0_5 = arith.constant 0 : index
    %c0_6 = arith.constant 0 : index
    %5 = vector.load %arg4[%c0_5, %c0_6] : memref<1x512xf32, #tpu.memory_space<vmem>>, vector<1x512xf32>
    tpu.vector_store %arg4[%c0_5, %c0_6], %4 {strides = array<i32>} : memref<1x512xf32, #tpu.memory_space<vmem>>, vector<1x512xf32>,
    return
  }
  func.func @transform_0(%arg0: i32) -> (i32, i32) {
    %c0_i32 = arith.constant 0 : i32
    %c0_i32_0 = arith.constant 0 : i32
    %c0_i32_1 = arith.constant 0 : i32
    return %c0_i32, %c0_i32_0 : i32, i32
  }
  func.func @transform_1(%arg0: i32) -> (i32, i32) {
    %c0_i32 = arith.constant 0 : i32
    %c0_i32_0 = arith.constant 0 : i32
    %c0_i32_1 = arith.constant 0 : i32
    return %c0_i32, %c0_i32_0 : i32, i32
  }
  func.func @transform_2(%arg0: i32) -> (i32, i32) {
    %c0_i32 = arith.constant 0 : i32
    %c0_i32_0 = arith.constant 0 : i32
    return %arg0, %c0_i32 : i32, i32
  }
  func.func @transform_3(%arg0: i32) -> (i32, i32) {
    %c0_i32 = arith.constant 0 : i32
    %c0_i32_0 = arith.constant 0 : i32
    return %arg0, %c0_i32 : i32, i32
  }
}

</mosaic_0001>

<bundles_post_ra>
// kernel: squeeze.3
= control target key start
LH: loop header
LB: loop body
LE: loop exit
PB: predicated region body
PF: predicated region fallthrough
CT: control target
= control target key end

     0   :  { %vm7_vm0 = vcmask 523264   ;;  %vm13_vm1 = vcmask 1048064   ;;  %s39_s0 = inlined_call_operand.vmem [shape: f32[2,64], index: 0, kind: input, shape index: {}]   ;;  %s40_s1 = inlined_call_operand.vmem [shape: f32[1,128], index: 1, kind: output, shape index: {}]  }
   0x1   :  { %v4_v0 = vld [vmem:[%s39_s0] sm:$0x3]  ;;  %s22_s0 = smov 64  }
   0x2   :  { %5 = vst [vmem:[#allocation1] sm:$0x3] %v4_v0 }
   0x9   :  { %v10_v1 = vld [vmem:[#allocation1 + $0x1] sm:$0x1]   ;;  %v6_v2 = vld [vmem:[#allocation1] sm:$0x1]  }
   0xa   :  { %11 = vrot.lane.b32.xlu0 %v10_v1, %s22_s0  ;;  %8 = vst.msk [vmem:[#allocation0] sm:$0x1] %vm7_vm0, %v6_v2  }
  0x7c   :  { %v12_v3 = vpop.permute.xlu0 %11  }
  0x7d   :  { %14 = vst.msk [vmem:[#allocation0] sm:$0x1] %vm13_vm1, %v12_v3  }
  0x84   :  { %v17_v4 = vld [vmem:[#allocation0] sm:$0x1] }
  0x85   :  { %20 = vst [vmem:[%s40_s1] sm:$0x1] %v17_v4 }

// kernel: signal_embedding.1
= control target key start
LH: loop header
LB: loop body
LE: loop exit
PB: predicated region body
PF: predicated region fallthrough
CT: control target
= control target key end

     0   :  { %vm176_vm0 = vcmask 1040384   ;;  %vm178_vm1 = vcmask 1042434   ;;  %vm180_vm2 = vcmask 1041408   ;;  %s413_s0 = inlined_call_operand.vmem [shape: f32[128,512], index: 0, kind: input, shape index: {}]   ;;  %s414_s2 = inlined_call_operand.vmem [shape: f32[1,128], index: 2, kind: input, shape index: {}]   ;;  %s415_s1 = inlined_call_operand.vmem [shape: f32[1,512], index: 1, kind: input, shape index: {}]   ;;  %s416_s3 = inlined_call_operand.vmem [shape: f32[1,512], index: 3, kind: output, shape index: {}]  }
   0x1   :  { %v77_v0 = vld [vmem:[%s413_s0 + $0x1f0] sm:$0xff]  ;;  %v78_v1 = vld [vmem:[%s413_s0 + $0x1f8] sm:$0xff]  ;;  %v76_v6 = vld [vmem:[%s413_s0 + $0x1e8] sm:$0xff] }
   0x2   :  { %v73_v2 = vld [vmem:[%s413_s0 + $0x1d0] sm:$0xff]  ;;  %129 = vmatpush.msra.mxu2 %v77_v0  ;;  %149 = vmatpush.msra.mxu3 %v78_v1  ;;  %v74_v3 = vld [vmem:[%s413_s0 + $0x1d8] sm:$0xff]  ;;  %v75_v7 = vld [vmem:[%s413_s0 + $0x1e0] sm:$0xff] }
   0x3   :  { %v69_v4 = vld [vmem:[%s413_s0 + $0x1b0] sm:$0xff]  ;;  %v70_v5 = vld [vmem:[%s413_s0 + $0x1b8] sm:$0xff]  ;;  %v72_v8 = vld [vmem:[%s413_s0 + $0x1c8] sm:$0xff]  ;;  %109 = vmatpush.msra.mxu1 %v76_v6  ;;  %89 = vmatpush.msra.mxu0 %v75_v7 }
   0x4   :  { %130 = vmatpush.msra.mxu2 %v73_v2  ;;  %150 = vmatpush.msra.mxu3 %v74_v3  ;;  %v65_v9 = vld [vmem:[%s413_s0 + $0x190] sm:$0xff]  ;;  %v66_v10 = vld [vmem:[%s413_s0 + $0x198] sm:$0xff]  ;;  %v71_v11 = vld [vmem:[%s413_s0 + $0x1c0] sm:$0xff] }
   0x5   :  { %v68_v12 = vld [vmem:[%s413_s0 + $0x1a8] sm:$0xff]  ;;  %v67_v13 = vld [vmem:[%s413_s0 + $0x1a0] sm:$0xff]  ;;  %110 = vmatpush.msra.mxu1 %v72_v8  ;;  %v61_v14 = vld [vmem:[%s413_s0 + $0x170] sm:$0xff]  ;;  %90 = vmatpush.msra.mxu0 %v71_v11 }
   0x6   :  { %131 = vmatpush.msra.mxu2 %v69_v4  ;;  %151 = vmatpush.msra.mxu3 %v70_v5  ;;  %v62_v15 = vld [vmem:[%s413_s0 + $0x178] sm:$0xff]  ;;  %v64_v16 = vld [vmem:[%s413_s0 + $0x188] sm:$0xff]  ;;  %v63_v17 = vld [vmem:[%s413_s0 + $0x180] sm:$0xff] }
   0x7   :  { %111 = vmatpush.msra.mxu1 %v68_v12  ;;  %v57_v18 = vld [vmem:[%s413_s0 + $0x150] sm:$0xff]  ;;  %v58_v19 = vld [vmem:[%s413_s0 + $0x158] sm:$0xff]  ;;  %91 = vmatpush.msra.mxu0 %v67_v13  ;;  %v60_v20 = vld [vmem:[%s413_s0 + $0x168] sm:$0xff]  ;;  %v183_v12 = vlaneseq }
   0x8   :  { %132 = vmatpush.msra.mxu2 %v65_v9  ;;  %152 = vmatpush.msra.mxu3 %v66_v10  ;;  %v59_v21 = vld [vmem:[%s413_s0 + $0x160] sm:$0xff]  ;;  %v53_v22 = vld [vmem:[%s413_s0 + $0x130] sm:$0xff]  ;;  %v54_v23 = vld [vmem:[%s413_s0 + $0x138] sm:$0xff] }
   0x9   :  { %112 = vmatpush.msra.mxu1 %v64_v16  ;;  %92 = vmatpush.msra.mxu0 %v63_v17  ;;  %v56_v24 = vld [vmem:[%s413_s0 + $0x148] sm:$0xff]  ;;  %v55_v25 = vld [vmem:[%s413_s0 + $0x140] sm:$0xff]  ;;  %v49_v26 = vld [vmem:[%s413_s0 + $0x110] sm:$0xff]  ;;  %vm185_vm3 = vcmp.lt.s32.totalorder %v183_v12, 512 }
   0xa   :  { %133 = vmatpush.msra.mxu2 %v61_v14  ;;  %153 = vmatpush.msra.mxu3 %v62_v15  ;;  %v50_v27 = vld [vmem:[%s413_s0 + $0x118] sm:$0xff]  ;;  %v52_v28 = vld [vmem:[%s413_s0 + $0x128] sm:$0xff]  ;;  %v51_v29 = vld [vmem:[%s413_s0 + $0x120] sm:$0xff] }
   0xb   :  { %113 = vmatpush.msra.mxu1 %v60_v20  ;;  %93 = vmatpush.msra.mxu0 %v59_v21  ;;  %v45_v30 = vld [vmem:[%s413_s0 + $0xf0] sm:$0xff]  ;;  %v46_v31 = vld [vmem:[%s413_s0 + $0xf8] sm:$0xff]  ;;  %v48_v32 = vld [vmem:[%s413_s0 + $0x108] sm:$0xff] }
   0xc   :  { %134 = vmatpush.msra.mxu2 %v57_v18  ;;  %154 = vmatpush.msra.mxu3 %v58_v19  ;;  %v47_v33 = vld [vmem:[%s413_s0 + $0x100] sm:$0xff]  ;;  %v41_v34 = vld [vmem:[%s413_s0 + $0xd0] sm:$0xff]  ;;  %v42_v35 = vld [vmem:[%s413_s0 + $0xd8] sm:$0xff] }
   0xd   :  { %114 = vmatpush.msra.mxu1 %v56_v24  ;;  %94 = vmatpush.msra.mxu0 %v55_v25  ;;  %v44_v36 = vld [vmem:[%s413_s0 + $0xe8] sm:$0xff]  ;;  %v43_v37 = vld [vmem:[%s413_s0 + $0xe0] sm:$0xff]  ;;  %v37_v38 = vld [vmem:[%s413_s0 + $0xb0] sm:$0xff] }
   0xe   :  { %135 = vmatpush.msra.mxu2 %v53_v22  ;;  %155 = vmatpush.msra.mxu3 %v54_v23  ;;  %v38_v39 = vld [vmem:[%s413_s0 + $0xb8] sm:$0xff]  ;;  %v40_v40 = vld [vmem:[%s413_s0 + $0xc8] sm:$0xff]  ;;  %v39_v41 = vld [vmem:[%s413_s0 + $0xc0] sm:$0xff] }
   0xf   :  { %115 = vmatpush.msra.mxu1 %v52_v28  ;;  %95 = vmatpush.msra.mxu0 %v51_v29  ;;  %v33_v42 = vld [vmem:[%s413_s0 + $0x90] sm:$0xff]  ;;  %v34_v43 = vld [vmem:[%s413_s0 + $0x98] sm:$0xff]  ;;  %v36_v44 = vld [vmem:[%s413_s0 + $0xa8] sm:$0xff] }
  0x10   :  { %136 = vmatpush.msra.mxu2 %v49_v26  ;;  %156 = vmatpush.msra.mxu3 %v50_v27  ;;  %v35_v45 = vld [vmem:[%s413_s0 + $0xa0] sm:$0xff]  ;;  %v29_v46 = vld [vmem:[%s413_s0 + $0x70] sm:$0xff]  ;;  %v30_v47 = vld [vmem:[%s413_s0 + $0x78] sm:$0xff] }
  0x11   :  { %116 = vmatpush.msra.mxu1 %v48_v32  ;;  %96 = vmatpush.msra.mxu0 %v47_v33  ;;  %v32_v48 = vld [vmem:[%s413_s0 + $0x88] sm:$0xff]  ;;  %v31_v49 = vld [vmem:[%s413_s0 + $0x80] sm:$0xff]  ;;  %v25_v50 = vld [vmem:[%s413_s0 + $0x50] sm:$0xff] }
  0x12   :  { %137 = vmatpush.msra.mxu2 %v45_v30  ;;  %157 = vmatpush.msra.mxu3 %v46_v31  ;;  %v26_v51 = vld [vmem:[%s413_s0 + $0x58] sm:$0xff]  ;;  %v28_v52 = vld [vmem:[%s413_s0 + $0x68] sm:$0xff]  ;;  %v27_v53 = vld [vmem:[%s413_s0 + $0x60] sm:$0xff] }
  0x13   :  { %117 = vmatpush.msra.mxu1 %v44_v36  ;;  %97 = vmatpush.msra.mxu0 %v43_v37  ;;  %v21_v54 = vld [vmem:[%s413_s0 + $0x30] sm:$0xff]  ;;  %v22_v55 = vld [vmem:[%s413_s0 + $0x38] sm:$0xff]  ;;  %v24_v56 = vld [vmem:[%s413_s0 + $0x48] sm:$0xff] }
  0x14   :  { %138 = vmatpush.msra.mxu2 %v41_v34  ;;  %158 = vmatpush.msra.mxu3 %v42_v35  ;;  %v23_v57 = vld [vmem:[%s413_s0 + $0x40] sm:$0xff]  ;;  %v17_v58 = vld [vmem:[%s413_s0 + $0x10] sm:$0xff]  ;;  %v18_v59 = vld [vmem:[%s413_s0 + $0x18] sm:$0xff] }
  0x15   :  { %118 = vmatpush.msra.mxu1 %v40_v40  ;;  %98 = vmatpush.msra.mxu0 %v39_v41  ;;  %v14_v60 = vld [vmem:[%s414_s2] sm:$0x1]  ;;  %v20_v61 = vld [vmem:[%s413_s0 + $0x28] sm:$0xff] }
  0x16   :  { %139 = vmatpush.msra.mxu2 %v37_v38  ;;  %159 = vmatpush.msra.mxu3 %v38_v39  ;;  %v19_v62 = vld [vmem:[%s413_s0 + $0x20] sm:$0xff]  ;;  %v16_v63 = vld [vmem:[%s413_s0 + $0x8] sm:$0xff] }
  0x17   :  { %119 = vmatpush.msra.mxu1 %v36_v44  ;;  %99 = vmatpush.msra.mxu0 %v35_v45  ;;  %v15_v0 = vld [vmem:[%s413_s0] sm:$0xff] }
  0x18   :  { %140 = vmatpush.msra.mxu2 %v33_v42  ;;  %160 = vmatpush.msra.mxu3 %v34_v43  ;;  %v79_v1 = vld [vmem:[%s415_s1] sm:$0xf] }
  0x19   :  { %120 = vmatpush.msra.mxu1 %v32_v48  ;;  %100 = vmatpush.msra.mxu0 %v31_v49  ;;  %v82_v2 = vperm.slane %v79_v1, 1  ;;  %v81_v3 = vperm.slane %v79_v1, 0  ;;  %v83_v4 = vperm.slane %v79_v1, 2  ;;  %v84_v5 = vperm.slane %v79_v1, 3 }
  0x1a   :  { %141 = vmatpush.msra.mxu2 %v29_v46  ;;  %161 = vmatpush.msra.mxu3 %v30_v47 }
  0x1b   :  { %121 = vmatpush.msra.mxu1 %v28_v52  ;;  %101 = vmatpush.msra.mxu0 %v27_v53 }
  0x1c   :  { %142 = vmatpush.msra.mxu2 %v25_v50  ;;  %162 = vmatpush.msra.mxu3 %v26_v51 }
  0x1d   :  { %122 = vmatpush.msra.mxu1 %v24_v56  ;;  %102 = vmatpush.msra.mxu0 %v23_v57 }
  0x1e   :  { %143 = vmatpush.msra.mxu2 %v21_v54  ;;  %163 = vmatpush.msra.mxu3 %v22_v55 }
  0x1f   :  { %123 = vmatpush.msra.mxu1 %v20_v61  ;;  %103 = vmatpush.msra.mxu0 %v19_v62 }
  0x20   :  { %144 = vmatpush.msra.mxu2 %v17_v58  ;;  %164 = vmatpush.msra.mxu3 %v18_v59 }
  0x21   :  { %145 = vmatmul.f32.vlgmr.msra.gmra.mxu2 %v14_v60  ;;  %165 = vmatmul.f32.vlgmr.msra.gmra.mxu3 %v14_v60 }
  0x22   :  { %124 = vmatpush.msra.mxu1 %v16_v63  ;;  %104 = vmatpush.msra.mxu0 %v15_v0 }
  0x23   :  { %125 = vmatmul.f32.vlgmr.msra.gmra.mxu1 %v14_v60  ;;  %105 = vmatmul.f32.vlgmr.msra.gmra.mxu0 %v14_v60 }
  0xa0   :  { %v126_v6 = vpop.f32.mrf.mxu1  ;;  %v106_v7 = vpop.f32.mrf.mxu0 }
  0xa1   :  { %v127_v8 = vadd.f32 %v126_v6, %v82_v2  ;;  %v107_v9 = vadd.f32 %v106_v7, %v81_v3 }
  0xa3   :  { %v173_v13 = vrot.slane %v127_v8, 7 }
  0xa4   :  { %v146_v10 = vpop.f32.mrf.mxu2  ;;  %v166_v11 = vpop.f32.mrf.mxu3 }
  0xa5   :  { %v147_v14 = vadd.f32 %v146_v10, %v83_v4  ;;  %v167_v15 = vadd.f32 %v166_v11, %v84_v5  ;;  %v177_v18 = vsel %vm176_vm0, %v107_v9, %v173_v13 }
  0xa7   :  { %v174_v16 = vrot.slane %v147_v14, 6  ;;  %v175_v17 = vrot.slane %v167_v15, 5 }
  0xa9   :  { %v179_v19 = vsel %vm178_vm1, %v174_v16, %v175_v17 }
  0xaa   :  { %v181_v20 = vsel %vm180_vm2, %v177_v18, %v179_v19 }
  0xab   :  { %187 = vst.msk [vmem:[%s416_s3] sm:$0xf] %vm185_vm3, %v181_v20 }

</bundles_post_ra>
